<compile_context>
chip_gen: v5e
topology: v5e:2x2
jax: 0.10.0
libtpu: 0.0.40
codegen_flags: <defaults>
</compile_context>

<pallas_src>
import functools
import math

import jax
import jax.numpy as jnp
import numpy as np
from jax.experimental import pallas as pl
from jax.experimental.pallas import tpu as pltpu


def _round_up(x, m):
  return ((x + m - 1) // m) * m


def _temporal_block_kernel(*refs, c_in, c_out, tile_l, ksize, dilation, pad,
                           pad128, has_downsample):
  """One (batch, time-tile) grid step.

  refs (in order):
    x_ref   : (c_in,  tile_l)              f32   current input time tile
    w1_ref  : (K, c_out, c_in)             bf16  conv1 weights, tap-major
    b1_ref  : (c_out, 1)                   f32
    w2_ref  : (K, c_out, c_out)            bf16  conv2 weights, tap-major
    b2_ref  : (c_out, 1)                   f32
    [wd_ref : (c_out, c_in) bf16, bd_ref : (c_out, 1) f32]  (only if downsample)
    o_ref   : (c_out, tile_l)              f32   output tile
    xp_sc   : (c_in,  pad128 + tile_l)     bf16  input  halo scratch (persistent)
    h1p_sc  : (c_out, pad128 + tile_l)     bf16  hidden halo scratch (persistent)
  The tile lives at lane offset pad128 (128-aligned, unmasked stores); the
  causal halo occupies lanes [pad128 - pad, pad128).
  """
  if has_downsample:
    (x_ref, w1_ref, b1_ref, w2_ref, b2_ref, wd_ref, bd_ref,
     o_ref, xp_sc, h1p_sc) = refs
  else:
    (x_ref, w1_ref, b1_ref, w2_ref, b2_ref,
     o_ref, xp_sc, h1p_sc) = refs
    wd_ref = bd_ref = None

  t = pl.program_id(1)
  off = pad128 - pad          # first halo lane actually read by the taps

  # Causal left padding: zero the halo at the start of each batch's time loop.
  if pad:
    @pl.when(t == 0)
    def _():
      xp_sc[:, off:pad128] = jnp.zeros((c_in, pad), jnp.bfloat16)
      h1p_sc[:, off:pad128] = jnp.zeros((c_out, pad), jnp.bfloat16)

  x = x_ref[...]                                  # (c_in, tile_l) f32
  xb = x.astype(jnp.bfloat16)
  xp_sc[:, pad128:] = xb                          # lane-aligned bf16 store

  def dilated_conv(w_ref, b_ref, src_sc):
    # K accumulating MXU matmuls over shifted views of the halo scratch;
    # output column j (global) uses input columns j - pad + k*dilation.
    acc = jnp.dot(w_ref[0], src_sc[:, off:off + tile_l],
                  preferred_element_type=jnp.float32)
    for k in range(1, ksize):
      s = off + k * dilation
      acc = acc + jnp.dot(w_ref[k], src_sc[:, s:s + tile_l],
                          preferred_element_type=jnp.float32)
    return jnp.maximum(acc + b_ref[...], 0.0)     # bias + relu (f32)

  # ---- conv1 (dilated, causal) + relu (+ dropout = identity) ---------------
  h1 = dilated_conv(w1_ref, b1_ref, xp_sc)
  if pad:  # carry the last `pad` input columns into the halo for the next tile
    xp_sc[:, off:pad128] = xp_sc[:, pad128 + tile_l - pad:pad128 + tile_l]

  # ---- conv2 ----------------------------------------------------------------
  h1p_sc[:, pad128:] = h1.astype(jnp.bfloat16)    # lane-aligned bf16 store
  h2 = dilated_conv(w2_ref, b2_ref, h1p_sc)
  if pad:
    h1p_sc[:, off:pad128] = h1p_sc[:, pad128 + tile_l - pad:pad128 + tile_l]

  # ---- residual branch + final ReLU -----------------------------------------
  if has_downsample:
    res = jnp.dot(wd_ref[...], xb, preferred_element_type=jnp.float32) \
        + bd_ref[...]
  else:
    res = x                                       # exact f32 identity residual

  o_ref[...] = jnp.maximum(h2 + res, 0.0).astype(o_ref.dtype)


def temporal_block(x, params, *, kernel_size, dilation, tile_l=None):
  """x: (B, C_in, L) float32 -> (B, C_out, L) float32."""
  w1, b1, w2, b2, wd, bd = params
  batch, c_in, seq_len = x.shape
  c_out = w1.shape[0]
  has_downsample = wd is not None
  if not has_downsample and c_in != c_out:
    raise ValueError("identity residual requires c_in == c_out")
  pad = dilation * (kernel_size - 1)
  pad128 = _round_up(pad, 128) if pad else 0

  # Lane-dense time tiling (multiple of 128).  1024 keeps per-step overhead
  # amortized while the VMEM footprint stays far under the scoped limits on
  # v5e/v6e (128 MiB phys) and v7x (64 MiB phys).
  if tile_l is None:
    tile_l = min(1024, _round_up(seq_len, 128))
  tile_l = _round_up(tile_l, 128)
  tile_l = max(tile_l, pad128 if pad else 128)    # halo carry needs pad <= tile
  l_pad = _round_up(seq_len, tile_l)
  n_t = l_pad // tile_l

  # Sublane-dense channel padding (multiples of 8).
  c_in_p = _round_up(c_in, 8)
  c_out_p = _round_up(c_out, 8)

  # Skip wrapper HBM pad pass when the input is already aligned.
  xf = x.astype(jnp.float32)
  if c_in_p != c_in or l_pad != seq_len:
    xf = jnp.pad(xf, ((0, 0), (0, c_in_p - c_in), (0, l_pad - seq_len)))

  def prep_w(w, co, ci):
    # (c_out, c_in, K) -> tap-major (K, co, ci) zero-padded, bf16.
    wt = jnp.transpose(w.astype(jnp.float32), (2, 0, 1))
    if co != wt.shape[1] or ci != wt.shape[2]:
      wt = jnp.pad(wt, ((0, 0), (0, co - wt.shape[1]), (0, ci - wt.shape[2])))
    return wt.astype(jnp.bfloat16)

  def prep_b(b, co):
    bb = b.reshape(-1, 1).astype(jnp.float32)
    if co != bb.shape[0]:
      bb = jnp.pad(bb, ((0, co - bb.shape[0]), (0, 0)))
    return bb

  args = [xf, prep_w(w1, c_out_p, c_in_p), prep_b(b1, c_out_p),
          prep_w(w2, c_out_p, c_out_p), prep_b(b2, c_out_p)]
  in_specs = [
      pl.BlockSpec((pl.Squeezed(), c_in_p, tile_l), lambda b, t: (b, 0, t)),
      pl.BlockSpec((kernel_size, c_out_p, c_in_p), lambda b, t: (0, 0, 0)),
      pl.BlockSpec((c_out_p, 1), lambda b, t: (0, 0)),
      pl.BlockSpec((kernel_size, c_out_p, c_out_p), lambda b, t: (0, 0, 0)),
      pl.BlockSpec((c_out_p, 1), lambda b, t: (0, 0)),
  ]
  if has_downsample:
    wdp = wd.astype(jnp.float32)
    if c_out_p != c_out or c_in_p != c_in:
      wdp = jnp.pad(wdp, ((0, c_out_p - c_out), (0, c_in_p - c_in)))
    args += [wdp.astype(jnp.bfloat16), prep_b(bd, c_out_p)]
    in_specs += [
        pl.BlockSpec((c_out_p, c_in_p), lambda b, t: (0, 0)),
        pl.BlockSpec((c_out_p, 1), lambda b, t: (0, 0)),
    ]

  kern = functools.partial(
      _temporal_block_kernel,
      c_in=c_in_p, c_out=c_out_p, tile_l=tile_l,
      ksize=kernel_size, dilation=dilation, pad=pad, pad128=pad128,
      has_downsample=has_downsample)

  out = pl.pallas_call(
      kern,
      out_shape=jax.ShapeDtypeStruct((batch, c_out_p, l_pad), jnp.float32),
      grid_spec=pltpu.PrefetchScalarGridSpec(
          num_scalar_prefetch=0,
          grid=(batch, n_t),
          in_specs=in_specs,
          out_specs=pl.BlockSpec((pl.Squeezed(), c_out_p, tile_l),
                                 lambda b, t: (b, 0, t)),
          scratch_shapes=[
              pltpu.VMEM((c_in_p, pad128 + tile_l), jnp.bfloat16),   # x halo
              pltpu.VMEM((c_out_p, pad128 + tile_l), jnp.bfloat16),  # h1 halo
          ]),
      compiler_params=pltpu.CompilerParams(
          # Batch is independent -> parallel (megacore); time carries the
          # causal halo in persistent scratch -> arbitrary (sequential).
          dimension_semantics=("parallel", "arbitrary")),
  )(*args)

  if c_out_p != c_out or l_pad != seq_len:
    out = out[:, :c_out, :seq_len]
  return out


def init_params(key, c_in, c_out, kernel_size):
  """Deterministic init matching TemporalBlock.init_weights (eval semantics).

  weight_norm: w = g * v / ||v||_(dims 1,2); at init g = ||v||, so w == v.
  The reparameterization is folded into the weights here (wrapper side).
  """
  k = jax.random.split(key, 6)

  def wn(v):
    norm = jnp.sqrt(jnp.sum(v * v, axis=(1, 2), keepdims=True))
    return norm * v / norm  # g <- ||v|| at init

  v1 = 0.01 * jax.random.normal(k[0], (c_out, c_in, kernel_size), jnp.float32)
  v2 = 0.01 * jax.random.normal(k[1], (c_out, c_out, kernel_size), jnp.float32)
  w1, w2 = wn(v1), wn(v2)

  bnd1 = 1.0 / math.sqrt(c_in * kernel_size)
  bnd2 = 1.0 / math.sqrt(c_out * kernel_size)
  b1 = jax.random.uniform(k[2], (c_out, 1), jnp.float32, -bnd1, bnd1)
  b2 = jax.random.uniform(k[3], (c_out, 1), jnp.float32, -bnd2, bnd2)

  if c_in != c_out:
    wd = 0.01 * jax.random.normal(k[4], (c_out, c_in), jnp.float32)
    bndd = 1.0 / math.sqrt(c_in)
    bd = jax.random.uniform(k[5], (c_out, 1), jnp.float32, -bndd, bndd)
  else:  # downsample is None -> identity residual (no matmul in kernel)
    wd = bd = None

  return w1, b1, w2, b2, wd, bd


def temporal_block_reference(x, params, *, kernel_size, dilation):
  """Pure-JAX reference (matches the PyTorch module in eval mode)."""
  w1, b1, w2, b2, wd, bd = params
  pad = dilation * (kernel_size - 1)

  def causal_conv(h, w, b):
    hp = jnp.pad(h, ((0, 0), (0, 0), (pad, 0)))
    L = h.shape[-1]
    acc = jnp.zeros((h.shape[0], w.shape[0], L), jnp.float32) + b.reshape(1, -1, 1)
    for k in range(kernel_size):
      acc = acc + jnp.einsum('oi,bil->bol', w[:, :, k],
                             hp[:, :, k * dilation:k * dilation + L])
    return acc

  h1 = jax.nn.relu(causal_conv(x, w1, b1))
  h2 = jax.nn.relu(causal_conv(h1, w2, b2))
  res = x if wd is None else jnp.einsum('oi,bil->bol', wd, x) + bd.reshape(1, -1, 1)
  return jax.nn.relu(h2 + res)


if __name__ == "__main__":
  # Shapes consistent with TemporalBlock(n_inputs=4, n_outputs=8,
  # kernel_size=3, stride=1, dilation=2, padding=(3-1)*2=4).
  B, C_IN, C_OUT, L = 2, 4, 8, 16
  K, DIL = 3, 2

  key = jax.random.PRNGKey(0)
  xkey, pkey = jax.random.split(key)
  x = jax.random.normal(xkey, (B, C_IN, L), jnp.float32)
  params = init_params(pkey, C_IN, C_OUT, K)

  y = temporal_block(x, params, kernel_size=K, dilation=DIL)
  jax.block_until_ready(y)
  assert y.shape == (B, C_OUT, L) and y.dtype == jnp.float32

  # Sanity-check against the pure-JAX reference (bf16 MXU operands -> loose atol).
  y_ref = temporal_block_reference(x, params, kernel_size=K, dilation=DIL)
  np.testing.assert_allclose(np.asarray(y), np.asarray(y_ref), atol=2e-2, rtol=0)

  print("KERNEL_OK")
</pallas_src>

<mosaic_0001>
module attributes {stable_mosaic.version = 11 : i64} {
  func.func @_temporal_block_kernel(%arg0: i32, %arg1: i32, %arg2: memref<1x8x128xf32, #tpu.memory_space<vmem>>, %arg3: memref<3x8x8xbf16, #tpu.memory_space<vmem>>, %arg4: memref<8x1xf32, #tpu.memory_space<vmem>>, %arg5: memref<3x8x8xbf16, #tpu.memory_space<vmem>>, %arg6: memref<8x1xf32, #tpu.memory_space<vmem>>, %arg7: memref<8x8xbf16, #tpu.memory_space<vmem>>, %arg8: memref<8x1xf32, #tpu.memory_space<vmem>>, %arg9: memref<1x8x128xf32, #tpu.memory_space<vmem>>, %arg10: memref<8x256xbf16, #tpu.memory_space<vmem>>, %arg11: memref<8x256xbf16, #tpu.memory_space<vmem>>) attributes {dimension_semantics = [#tpu.dimension_semantics<parallel>, #tpu.dimension_semantics<arbitrary>], iteration_bounds = array<i64: 2, 1>, scalar_prefetch = 0 : i64, scratch_operands = 2 : i64, tpu.core_type = #tpu.core_type<tc>, window_params = [{transform_indices = @transform_0, window_bounds = array<i64: 1, 8, 128>}, {pipeline_mode = #tpu.pipeline_mode<synchronous>, transform_indices = @transform_1, window_bounds = array<i64: 3, 8, 8>}, {pipeline_mode = #tpu.pipeline_mode<synchronous>, transform_indices = @transform_2, window_bounds = array<i64: 8, 1>}, {pipeline_mode = #tpu.pipeline_mode<synchronous>, transform_indices = @transform_3, window_bounds = array<i64: 3, 8, 8>}, {pipeline_mode = #tpu.pipeline_mode<synchronous>, transform_indices = @transform_4, window_bounds = array<i64: 8, 1>}, {pipeline_mode = #tpu.pipeline_mode<synchronous>, transform_indices = @transform_5, window_bounds = array<i64: 8, 8>}, {pipeline_mode = #tpu.pipeline_mode<synchronous>, transform_indices = @transform_6, window_bounds = array<i64: 8, 1>}, {transform_indices = @transform_7, window_bounds = array<i64: 1, 8, 128>}]} {
    %c0_i32 = arith.constant 0 : i32
    %0 = arith.cmpi eq, %arg1, %c0_i32 : i32
    %1 = arith.extui %0 : i1 to i32
    %c0_i32_0 = arith.constant 0 : i32
    %2 = arith.cmpi ne, %1, %c0_i32_0 : i32
    scf.if %2 {
      %cst_59 = arith.constant 0.000000e+00 : bf16
      %62 = vector.broadcast %cst_59 : bf16 to vector<8x4xbf16>
      %c0_60 = arith.constant 0 : index
      %c124_61 = arith.constant 124 : index
      %63 = vector.load %arg10[%c0_60, %c124_61] : memref<8x256xbf16, #tpu.memory_space<vmem>>, vector<8x4xbf16>
      tpu.vector_store %arg10[%c0_60, %c124_61], %62 {strides = array<i32>} : memref<8x256xbf16, #tpu.memory_space<vmem>>, vector<8x4xbf16>,
      %cst_62 = arith.constant 0.000000e+00 : bf16
      %64 = vector.broadcast %cst_62 : bf16 to vector<8x4xbf16>
      %c0_63 = arith.constant 0 : index
      %c124_64 = arith.constant 124 : index
      %65 = vector.load %arg11[%c0_63, %c124_64] : memref<8x256xbf16, #tpu.memory_space<vmem>>, vector<8x4xbf16>
      tpu.vector_store %arg11[%c0_63, %c124_64], %64 {strides = array<i32>} : memref<8x256xbf16, #tpu.memory_space<vmem>>, vector<8x4xbf16>,
    } else {
    }
    %c0 = arith.constant 0 : index
    %c0_1 = arith.constant 0 : index
    %c0_2 = arith.constant 0 : index
    %3 = vector.load %arg2[%c0, %c0_1, %c0_2] : memref<1x8x128xf32, #tpu.memory_space<vmem>>, vector<1x8x128xf32>
    %4 = vector.shape_cast %3 : vector<1x8x128xf32> to vector<8x128xf32>
    %5 = arith.truncf %4 : vector<8x128xf32> to vector<8x128xbf16>
    %c0_3 = arith.constant 0 : index
    %c128 = arith.constant 128 : index
    %6 = vector.load %arg10[%c0_3, %c128] : memref<8x256xbf16, #tpu.memory_space<vmem>>, vector<8x128xbf16>
    tpu.vector_store %arg10[%c0_3, %c128], %5 {strides = array<i32>} : memref<8x256xbf16, #tpu.memory_space<vmem>>, vector<8x128xbf16>,
    %c0_4 = arith.constant 0 : index
    %c0_5 = arith.constant 0 : index
    %c0_6 = arith.constant 0 : index
    %7 = vector.load %arg3[%c0_4, %c0_5, %c0_6] : memref<3x8x8xbf16, #tpu.memory_space<vmem>>, vector<1x8x8xbf16>
    %8 = vector.shape_cast %7 : vector<1x8x8xbf16> to vector<8x8xbf16>
    %c0_7 = arith.constant 0 : index
    %c124 = arith.constant 124 : index
    %9 = vector.load %arg10[%c0_7, %c124] : memref<8x256xbf16, #tpu.memory_space<vmem>>, vector<8x128xbf16>
    %cst = arith.constant dense<0.000000e+00> : vector<8x128xf32>
    %10 = tpu.matmul %8, %9, %cst {dimension_numbers = #tpu.dot_dimension_numbers<[1], [0], [0], [1], [0, 0, 1, 1], [], []>} : vector<8x8xbf16>, vector<8x128xbf16>, vector<8x128xf32> -> vector<8x128xf32>
    %c1 = arith.constant 1 : index
    %c0_8 = arith.constant 0 : index
    %c0_9 = arith.constant 0 : index
    %11 = vector.load %arg3[%c1, %c0_8, %c0_9] : memref<3x8x8xbf16, #tpu.memory_space<vmem>>, vector<1x8x8xbf16>
    %12 = vector.shape_cast %11 : vector<1x8x8xbf16> to vector<8x8xbf16>
    %c0_10 = arith.constant 0 : index
    %c126 = arith.constant 126 : index
    %13 = vector.load %arg10[%c0_10, %c126] : memref<8x256xbf16, #tpu.memory_space<vmem>>, vector<8x128xbf16>
    %cst_11 = arith.constant dense<0.000000e+00> : vector<8x128xf32>
    %14 = tpu.matmul %12, %13, %cst_11 {dimension_numbers = #tpu.dot_dimension_numbers<[1], [0], [0], [1], [0, 0, 1, 1], [], []>} : vector<8x8xbf16>, vector<8x128xbf16>, vector<8x128xf32> -> vector<8x128xf32>
    %15 = arith.addf %10, %14 : vector<8x128xf32>
    %c2 = arith.constant 2 : index
    %c0_12 = arith.constant 0 : index
    %c0_13 = arith.constant 0 : index
    %16 = vector.load %arg3[%c2, %c0_12, %c0_13] : memref<3x8x8xbf16, #tpu.memory_space<vmem>>, vector<1x8x8xbf16>
    %17 = vector.shape_cast %16 : vector<1x8x8xbf16> to vector<8x8xbf16>
    %c0_14 = arith.constant 0 : index
    %c128_15 = arith.constant 128 : index
    %18 = vector.load %arg10[%c0_14, %c128_15] : memref<8x256xbf16, #tpu.memory_space<vmem>>, vector<8x128xbf16>
    %cst_16 = arith.constant dense<0.000000e+00> : vector<8x128xf32>
    %19 = tpu.matmul %17, %18, %cst_16 {dimension_numbers = #tpu.dot_dimension_numbers<[1], [0], [0], [1], [0, 0, 1, 1], [], []>} : vector<8x8xbf16>, vector<8x128xbf16>, vector<8x128xf32> -> vector<8x128xf32>
    %20 = arith.addf %15, %19 : vector<8x128xf32>
    %c0_17 = arith.constant 0 : index
    %c0_18 = arith.constant 0 : index
    %21 = vector.load %arg4[%c0_17, %c0_18] : memref<8x1xf32, #tpu.memory_space<vmem>>, vector<8x1xf32>
    %22 = vector.broadcast %21 : vector<8x1xf32> to vector<8x128xf32>
    %23 = arith.addf %20, %22 : vector<8x128xf32>
    %cst_19 = arith.constant 0.000000e+00 : f32
    %24 = vector.broadcast %cst_19 : f32 to vector<8x128xf32>
    %25 = arith.maximumf %23, %24 : vector<8x128xf32>
    %c0_20 = arith.constant 0 : index
    %c252 = arith.constant 252 : index
    %26 = vector.load %arg10[%c0_20, %c252] : memref<8x256xbf16, #tpu.memory_space<vmem>>, vector<8x4xbf16>
    %c0_21 = arith.constant 0 : index
    %c124_22 = arith.constant 124 : index
    %27 = vector.load %arg10[%c0_21, %c124_22] : memref<8x256xbf16, #tpu.memory_space<vmem>>, vector<8x4xbf16>
    tpu.vector_store %arg10[%c0_21, %c124_22], %26 {strides = array<i32>} : memref<8x256xbf16, #tpu.memory_space<vmem>>, vector<8x4xbf16>,
    %28 = arith.truncf %25 : vector<8x128xf32> to vector<8x128xbf16>
    %c0_23 = arith.constant 0 : index
    %c128_24 = arith.constant 128 : index
    %29 = vector.load %arg11[%c0_23, %c128_24] : memref<8x256xbf16, #tpu.memory_space<vmem>>, vector<8x128xbf16>
    tpu.vector_store %arg11[%c0_23, %c128_24], %28 {strides = array<i32>} : memref<8x256xbf16, #tpu.memory_space<vmem>>, vector<8x128xbf16>,
    %c0_25 = arith.constant 0 : index
    %c0_26 = arith.constant 0 : index
    %c0_27 = arith.constant 0 : index
    %30 = vector.load %arg5[%c0_25, %c0_26, %c0_27] : memref<3x8x8xbf16, #tpu.memory_space<vmem>>, vector<1x8x8xbf16>
    %31 = vector.shape_cast %30 : vector<1x8x8xbf16> to vector<8x8xbf16>
    %c0_28 = arith.constant 0 : index
    %c124_29 = arith.constant 124 : index
    %32 = vector.load %arg11[%c0_28, %c124_29] : memref<8x256xbf16, #tpu.memory_space<vmem>>, vector<8x128xbf16>
    %cst_30 = arith.constant dense<0.000000e+00> : vector<8x128xf32>
    %33 = tpu.matmul %31, %32, %cst_30 {dimension_numbers = #tpu.dot_dimension_numbers<[1], [0], [0], [1], [0, 0, 1, 1], [], []>} : vector<8x8xbf16>, vector<8x128xbf16>, vector<8x128xf32> -> vector<8x128xf32>
    %c1_31 = arith.constant 1 : index
    %c0_32 = arith.constant 0 : index
    %c0_33 = arith.constant 0 : index
    %34 = vector.load %arg5[%c1_31, %c0_32, %c0_33] : memref<3x8x8xbf16, #tpu.memory_space<vmem>>, vector<1x8x8xbf16>
    %35 = vector.shape_cast %34 : vector<1x8x8xbf16> to vector<8x8xbf16>
    %c0_34 = arith.constant 0 : index
    %c126_35 = arith.constant 126 : index
    %36 = vector.load %arg11[%c0_34, %c126_35] : memref<8x256xbf16, #tpu.memory_space<vmem>>, vector<8x128xbf16>
    %cst_36 = arith.constant dense<0.000000e+00> : vector<8x128xf32>
    %37 = tpu.matmul %35, %36, %cst_36 {dimension_numbers = #tpu.dot_dimension_numbers<[1], [0], [0], [1], [0, 0, 1, 1], [], []>} : vector<8x8xbf16>, vector<8x128xbf16>, vector<8x128xf32> -> vector<8x128xf32>
    %38 = arith.addf %33, %37 : vector<8x128xf32>
    %c2_37 = arith.constant 2 : index
    %c0_38 = arith.constant 0 : index
    %c0_39 = arith.constant 0 : index
    %39 = vector.load %arg5[%c2_37, %c0_38, %c0_39] : memref<3x8x8xbf16, #tpu.memory_space<vmem>>, vector<1x8x8xbf16>
    %40 = vector.shape_cast %39 : vector<1x8x8xbf16> to vector<8x8xbf16>
    %c0_40 = arith.constant 0 : index
    %c128_41 = arith.constant 128 : index
    %41 = vector.load %arg11[%c0_40, %c128_41] : memref<8x256xbf16, #tpu.memory_space<vmem>>, vector<8x128xbf16>
    %cst_42 = arith.constant dense<0.000000e+00> : vector<8x128xf32>
    %42 = tpu.matmul %40, %41, %cst_42 {dimension_numbers = #tpu.dot_dimension_numbers<[1], [0], [0], [1], [0, 0, 1, 1], [], []>} : vector<8x8xbf16>, vector<8x128xbf16>, vector<8x128xf32> -> vector<8x128xf32>
    %43 = arith.addf %38, %42 : vector<8x128xf32>
    %c0_43 = arith.constant 0 : index
    %c0_44 = arith.constant 0 : index
    %44 = vector.load %arg6[%c0_43, %c0_44] : memref<8x1xf32, #tpu.memory_space<vmem>>, vector<8x1xf32>
    %45 = vector.broadcast %44 : vector<8x1xf32> to vector<8x128xf32>
    %46 = arith.addf %43, %45 : vector<8x128xf32>
    %cst_45 = arith.constant 0.000000e+00 : f32
    %47 = vector.broadcast %cst_45 : f32 to vector<8x128xf32>
    %48 = arith.maximumf %46, %47 : vector<8x128xf32>
    %c0_46 = arith.constant 0 : index
    %c252_47 = arith.constant 252 : index
    %49 = vector.load %arg11[%c0_46, %c252_47] : memref<8x256xbf16, #tpu.memory_space<vmem>>, vector<8x4xbf16>
    %c0_48 = arith.constant 0 : index
    %c124_49 = arith.constant 124 : index
    %50 = vector.load %arg11[%c0_48, %c124_49] : memref<8x256xbf16, #tpu.memory_space<vmem>>, vector<8x4xbf16>
    tpu.vector_store %arg11[%c0_48, %c124_49], %49 {strides = array<i32>} : memref<8x256xbf16, #tpu.memory_space<vmem>>, vector<8x4xbf16>,
    %c0_50 = arith.constant 0 : index
    %c0_51 = arith.constant 0 : index
    %51 = vector.load %arg7[%c0_50, %c0_51] : memref<8x8xbf16, #tpu.memory_space<vmem>>, vector<8x8xbf16>
    %cst_52 = arith.constant dense<0.000000e+00> : vector<8x128xf32>
    %52 = tpu.matmul %51, %5, %cst_52 {dimension_numbers = #tpu.dot_dimension_numbers<[1], [0], [0], [1], [0, 0, 1, 1], [], []>} : vector<8x8xbf16>, vector<8x128xbf16>, vector<8x128xf32> -> vector<8x128xf32>
    %c0_53 = arith.constant 0 : index
    %c0_54 = arith.constant 0 : index
    %53 = vector.load %arg8[%c0_53, %c0_54] : memref<8x1xf32, #tpu.memory_space<vmem>>, vector<8x1xf32>
    %54 = vector.broadcast %53 : vector<8x1xf32> to vector<8x128xf32>
    %55 = arith.addf %52, %54 : vector<8x128xf32>
    %56 = arith.addf %48, %55 : vector<8x128xf32>
    %cst_55 = arith.constant 0.000000e+00 : f32
    %57 = vector.broadcast %cst_55 : f32 to vector<8x128xf32>
    %58 = arith.maximumf %56, %57 : vector<8x128xf32>
    %c0_56 = arith.constant 0 : index
    %c0_57 = arith.constant 0 : index
    %c0_58 = arith.constant 0 : index
    %59 = vector.load %arg9[%c0_56, %c0_57, %c0_58] : memref<1x8x128xf32, #tpu.memory_space<vmem>>, vector<1x8x128xf32>
    %60 = vector.shape_cast %59 : vector<1x8x128xf32> to vector<8x128xf32>
    %61 = vector.shape_cast %58 : vector<8x128xf32> to vector<1x8x128xf32>
    tpu.vector_store %arg9[%c0_56, %c0_57, %c0_58], %61 {strides = array<i32>} : memref<1x8x128xf32, #tpu.memory_space<vmem>>, vector<1x8x128xf32>,
    return
  }
  func.func @transform_0(%arg0: i32, %arg1: i32) -> (i32, i32, i32) {
    %c0_i32 = arith.constant 0 : i32
    %c0_i32_0 = arith.constant 0 : i32
    return %arg0, %c0_i32, %arg1 : i32, i32, i32
  }
  func.func @transform_1(%arg0: i32, %arg1: i32) -> (i32, i32, i32) {
    %c0_i32 = arith.constant 0 : i32
    %c0_i32_0 = arith.constant 0 : i32
    %c0_i32_1 = arith.constant 0 : i32
    %c0_i32_2 = arith.constant 0 : i32
    return %c0_i32, %c0_i32_0, %c0_i32_1 : i32, i32, i32
  }
  func.func @transform_2(%arg0: i32, %arg1: i32) -> (i32, i32) {
    %c0_i32 = arith.constant 0 : i32
    %c0_i32_0 = arith.constant 0 : i32
    %c0_i32_1 = arith.constant 0 : i32
    return %c0_i32, %c0_i32_0 : i32, i32
  }
  func.func @transform_3(%arg0: i32, %arg1: i32) -> (i32, i32, i32) {
    %c0_i32 = arith.constant 0 : i32
    %c0_i32_0 = arith.constant 0 : i32
    %c0_i32_1 = arith.constant 0 : i32
    %c0_i32_2 = arith.constant 0 : i32
    return %c0_i32, %c0_i32_0, %c0_i32_1 : i32, i32, i32
  }
  func.func @transform_4(%arg0: i32, %arg1: i32) -> (i32, i32) {
    %c0_i32 = arith.constant 0 : i32
    %c0_i32_0 = arith.constant 0 : i32
    %c0_i32_1 = arith.constant 0 : i32
    return %c0_i32, %c0_i32_0 : i32, i32
  }
  func.func @transform_5(%arg0: i32, %arg1: i32) -> (i32, i32) {
    %c0_i32 = arith.constant 0 : i32
    %c0_i32_0 = arith.constant 0 : i32
    %c0_i32_1 = arith.constant 0 : i32
    return %c0_i32, %c0_i32_0 : i32, i32
  }
  func.func @transform_6(%arg0: i32, %arg1: i32) -> (i32, i32) {
    %c0_i32 = arith.constant 0 : i32
    %c0_i32_0 = arith.constant 0 : i32
    %c0_i32_1 = arith.constant 0 : i32
    return %c0_i32, %c0_i32_0 : i32, i32
  }
  func.func @transform_7(%arg0: i32, %arg1: i32) -> (i32, i32, i32) {
    %c0_i32 = arith.constant 0 : i32
    %c0_i32_0 = arith.constant 0 : i32
    return %arg0, %c0_i32, %arg1 : i32, i32, i32
  }
}

</mosaic_0001>

<bundles_post_ra>
// kernel: tpu_custom_call.1
= control target key start
LH: loop header
LB: loop body
LE: loop exit
PB: predicated region body
PF: predicated region fallthrough
CT: control target
= control target key end

     0   :  { %12 = vsyncpa [#allocation5], 0  ;;  %s1140_s0 = inlined_call_operand.vmem [shape: f32[2,8,128], index: 0, kind: input, shape index: {}]   ;;  %s1141_s1 = inlined_call_operand.hbm [shape: bf16[3,8,8], index: 1, kind: input, shape index: {}]   ;;  %s1142_s2 = inlined_call_operand.vmem [shape: f32[8,1], index: 2, kind: input, shape index: {}]   ;;  %s1143_s3 = inlined_call_operand.hbm [shape: bf16[3,8,8], index: 3, kind: input, shape index: {}]   ;;  %s1144_s4 = inlined_call_operand.vmem [shape: f32[8,1], index: 4, kind: input, shape index: {}]   ;;  %s1145_s5 = inlined_call_operand.vmem [shape: bf16[8,8], index: 5, kind: input, shape index: {}]   ;;  %s1146_s6 = inlined_call_operand.vmem [shape: f32[8,1], index: 6, kind: input, shape index: {}]   ;;  %s1147_s7 = inlined_call_operand.hbm [shape: f32[2,8,128], index: 7, kind: output, shape index: {}]  }
   0x1   :  { %13 = vsyncpa [#allocation8], 0 }
   0x2   :  { %14 = vsyncpa [#allocation6], 0 }
   0x3   :  { %16 = vsyncpa [#allocation6 + $0x1], 0  ;;  %s969_s24 = smov 0   ;;  %s971_s25 = smov 0  }
   0x4   :  { %s973_s26 = smov 0   ;;  %s975_s27 = smov 0  }
   0x5   :  { %s977_s28 = smov 0   ;;  %s979_s29 = smov 0  }
   0x6 LB: > { %s668_s30 = sadd.s32 4294967295, %s920_s29   ;;  %s669_s8 = sadd.s32 4294967294, %s920_s29   ;;  %s920_s29 = sphi %s979_s29, %s22_s29   ;;  %s916_s28 = sphi %s977_s28, %s1156_s28   ;;  %s912_s27 = sphi %s975_s27, %s1155_s27   ;;  %s908_s26 = sphi %s973_s26, %s1154_s26   ;;  %s904_s25 = sphi %s971_s25, %s1153_s25   ;;  %s900_s24 = sphi %s969_s24, %s1152_s24  }
   0x7   : > { %s34_s9 = sadd.s32 1, %s916_s28  ;;  %s197_s10 = sadd.s32 1, %s908_s26 }
   0x8   : > { %p36_p0 = scmp.ge.s32.totalorder %s34_s9, 2  ;;  %p207_p1 = scmp.ne.s32.totalorder %s908_s26, %s904_s25 }
   0x9   : > { %p208_p2 = scmp.eq.s32.totalorder %s668_s30, 1  ;;  %p213_p3 = scmp.ne.s32.totalorder %s904_s25, %s900_s24 }
   0xa   : > { %s1158_s9 = smov (%p36_p0, %s34_s9), 0  ;;  %p214_p5 = scmp.eq.s32.totalorder %s669_s8, 1 }
   0xb   : > { %p1009_p4 = por %p208_p2, %p207_p1  ;;  %s192_s12 = ssub.s32 %s916_s28, %s1158_s9 }
   0xc   : > { %p670_p6 = scmp.ge.s32.totalorder %s920_s29, 1  ;;  %p195_p7 = scmp.eq.s32.totalorder %s192_s12, 0 }
   0xd   : > { %p1016_p8 = por %p214_p5, %p213_p3  ;;  %p221_p9 = scmp.lt.s32.totalorder %s920_s29, 3 }
   0xe   : > { %s1022_s14 = scalar_select %p195_p7, %s908_s26, %s197_s10  }
   0xf   : > { %p1024_p10 = pnand %p670_p6, %p221_p9  ;;  %p1028_p11 = scmp.eq.s32.totalorder %s668_s30, 0 }
  0x10   : > { %s232_s19 = sshll.u32 %s1141_s1, 4  ;;  %s922_s20 = smov [#allocation4]   ;;  %s233_s19 = int_to_ptr.hbm [resolvable:$true] %s232_s19 }
  0x11   : > { %p700_p12 = pneg %p1024_p10  ;;  %s234_s21 = sshll.u32 %s922_s20, 4  ;;  %s235_s21 = int_to_ptr.vmem [resolvable:$true] %s234_s21 }
  0x12   : > { %s249_s30 = sshll.u32 %s1143_s3, 4  ;;  %s923_s8 = smov 64   ;;  %s250_s30 = int_to_ptr.hbm [resolvable:$true] %s249_s30 }
  0x13   : > { %p701_p13 = pnand %p1028_p11, %p700_p12  ;;  %s924_s10 = smov 4  }
  0x14   : > { %s925_s12 = smov [#allocation7]   ;;  %286 = sbr.rel (%p1024_p10) target bundleno = 593 (0x251), region = 48 }
  0x15   : > { %703 = dma.hbm_to_vmem [thread:$0]  (!%p701_p13), %s233_s19, 192, %s235_s21, [#allocation5], %s923_s8, %s923_s8, %s924_s10  }
  0x16   : > { %s251_s17 = sshll.u32 %s925_s12, 4  ;;  %s252_s17 = int_to_ptr.vmem [resolvable:$true] %s251_s17 }
  0x17   : > { %706 = dma.hbm_to_vmem [thread:$0]  (!%p701_p13), %s250_s30, 192, %s252_s17, [#allocation8], %s923_s8, %s923_s8, %s924_s10  }
  0x19   : > { %887 = dma.done.wait (%p1028_p11), [#allocation5], 192  }
  0x1a   : > { %889 = vsyncadd (%p1028_p11), [#allocation5], 4294967104 }
  0x1b   : > { %891 = dma.done.wait (%p1028_p11), [#allocation8], 192  }
  0x1c   : > { %893 = vsyncadd (%p1028_p11), [#allocation8], 4294967104  ;;  %p326_p0 = scmp.lt.s32.totalorder %s912_s27, 1  ;;  %vm338_vm0 = vcmask 1044448   ;;  %v926_v0 = vmov 0   ;;  %vm363_vm1 = vcmask 1043456  }
  0x1d   : > { %339 = vst.msk [vmem:[#allocation2] sm:$0xf] %vm338_vm0, %v926_v0  ;;  %771 = vset.pattern.permute.xlu2 %v926_v0  ;;  %772 = vset.pattern.permute.xlu0 %v926_v0  ;;  %s927_s16 = smov 4   ;;  %s928_s22 = smov 2   ;;  %vm359_vm2 = vcmask 64512   ;;  %v428_v11 = vld [vmem:[%s1142_s2] sm:$0xff] }
  0x1e   : > { %s327_s15 = scalar_select %p326_p0, %s912_s27, 1  ;;  %340 = vst.msk [vmem:[#allocation3] sm:$0xf] %vm338_vm0, %v926_v0  ;;  %773 = vset.pattern.permute.xlu1 %v926_v0  ;;  %v406_v10 = vld [vmem:[#allocation4 + $0x8] sm:$0xf]  ;;  %431 = vperm.xlu2 %771, %v428_v11   ;;  %vm357_vm3 = vcmask 15360  }
  0x1f   : > { %vm384_vm4 = vcmask 31744   ;;  %v347_v20 = vld [vmem:[#allocation4 + $0x4] sm:$0xf]  ;;  %v344_v21 = vld [vmem:[#allocation4] sm:$0xf]  ;;  %v520_v44 = vld [vmem:[%s1144_s4] sm:$0xff] }
  0x20   : > { %s678_s18 = sshll.u32 %s327_s15, 3  ;;  %v529_v42 = vld [vmem:[%s1145_s5] sm:$0xf]  ;;  %v498_v43 = vld [vmem:[#allocation7 + $0x8] sm:$0xf]  ;;  %s323_s19 = sand.u32 1, %s904_s25  }
  0x21   : > { %s332_s21 = scalar_lea.vmem %s1140_s0, %s678_s18  ;;  %v530_v45 = vld [vmem:[%s1146_s6] sm:$0xff]  ;;  %v440_v55 = vld [vmem:[#allocation7] sm:$0xf]  ;;  %s677_s20 = sshll.u32 %s323_s19, 3 }
  0x22   : > { %v341_v1 = vld [vmem:[%s332_s21] sm:$0xff]  ;;  %s687_s21 = sshll.u32 %s912_s27, 3  ;;  %s325_s30 = scalar_lea.vmem [#allocation9], %s677_s20 }
  0x23   : > { %v1059_v2 = vpack.c.bf16 %v341_v1, %v341_v1  ;;  %v443_v54 = vld [vmem:[#allocation7 + $0x4] sm:$0xf]  ;;  %s570_s23 = scalar_lea.hbm %s1147_s7, %s687_s21  ;;  %s572_s8 = sshll.u32 %s325_s30, 4  ;;  %s573_s8 = int_to_ptr.vmem [resolvable:$true] %s572_s8 }
  0x24   : > { %s574_s10 = sshll.u32 %s570_s23, 4  ;;  %s559_s12 = scalar_lea.sflag [#allocation6], %s323_s19  ;;  %s575_s10 = int_to_ptr.hbm [resolvable:$true] %s574_s10 }
  0x25   : > { %343 = vst [vmem:[#allocation2 + $0x4] sm:$0xf] %v1059_v2  ;;  %v540_v41 = vsel %vm363_vm1, %v1059_v2, 0  ;;  %s848_s27 = sshra.s32 %s575_s10, 4  ;;  %s854_s21 = scalar_lea.hbm %s1147_s7, 16  ;;  %s849_s27 = int_to_ptr.hbm [resolvable:$true] %s848_s27 }
  0x26   : > { %s850_s17 = scalar_lea.hbm %s849_s27, 8  ;;  %p855_p5 = scmp.lt.s32.totalorder %s849_s27, %s1147_s7 }
  0x27   : > { %p851_p1 = scmp.ne.s32.totalorder %s849_s27, %s850_s17  ;;  %p856_p6 = scmp.lt.s32.totalorder %s854_s21, %s850_s17 }
  0x29   : > { %p852_p2 = pnand %p851_p1, %p1009_p4  ;;  %p857_p7 = por %p856_p6, %p855_p5 }
  0x2b   : > { %p853_p3 = pneg %p852_p2 }
  0x2c   : > { %v345_v3 = vld [vmem:[#allocation2] sm:$0xff] }
  0x2d   : > { %v407_v4 = vld [vmem:[#allocation2 + $0x4] sm:$0xf]  ;;  %v349_v5 = vunpack.c.l.b16 %v345_v3  ;;  %v350_v8 = vunpack.c.h.b16 %v345_v3  ;;  %p858_p9 = pnand %p857_p7, %p853_p3 }
  0x2e   : > { %v412_v6 = vsel %vm363_vm1, %v407_v4, 0  ;;  %437 = vst.msk [vmem:[#allocation2] sm:$0xf] %vm338_vm0, %v407_v4 }
  0x2f   : > { %421 = vmatpush.bf16.msra.mxu2 %v412_v6  ;;  %v351_v7 = vpack.c.b16 %v349_v5, %v349_v5  ;;  %v352_v9 = vpack.c.b16 %v350_v8, %v350_v8 }
  0x31   : > { %380 = vrot.lane.b32.xlu1 %v351_v7, %s927_s16  ;;  %353 = vrot.lane.b32.xlu0 %v351_v7, %s928_s22 }
  0x32   : > { %681 = vmatmul.msk.bf16.vlgmr.msra.gmra.mxu2 %vm359_vm2, %v406_v10 }
  0x33   : > { %549 = vmatpush.bf16.msrb.mxu2 %v540_v41 }
  0x39   : > { %382 = vrot.lane.b32.xlu1 %v352_v9, %s927_s16  ;;  %355 = vrot.lane.b32.xlu0 %v352_v9, %s928_s22 }
  0x42   : > { %685 = vmatmul.msk.bf16.vlgmr.msrb.gmra.mxu2 %vm359_vm2, %v529_v42 }
  0x78   : > { %v432_v27 = vpop.permute.xlu2 %431 }
  0xa3   : > { %v381_v12 = vpop.permute.xlu1 %380  ;;  %v354_v13 = vpop.permute.xlu0 %353 }
  0xab   : > { %v383_v14 = vpop.permute.xlu1 %382  ;;  %v356_v15 = vpop.permute.xlu0 %355 }
  0xac   : > { %v358_v16 = vsel %vm357_vm3, %v354_v13, %v356_v15  ;;  %v385_v17 = vsel %vm384_vm4, %v381_v12, %v383_v14 }
  0xad   : > { %v365_v18 = vsel %vm363_vm1, %v358_v16, 0  ;;  %v390_v19 = vsel %vm363_vm1, %v385_v17, 0 }
  0xae   : > { %374 = vmatpush.bf16.msra.mxu0 %v365_v18  ;;  %399 = vmatpush.bf16.msra.mxu1 %v390_v19 }
  0xb1   : > { %679 = vmatmul.msk.bf16.vlgmr.msra.gmra.mxu0 %vm359_vm2, %v347_v20  ;;  %680 = vmatmul.msk.bf16.vlgmr.msra.gmra.mxu1 %vm359_vm2, %v344_v21 }
  0xb5   : > { %v423_v22 = vpop.f32.mrf.mxu2 }
  0xbd   : > { %v425_v23 = vpop.f32.mrf.mxu2 }
  0xc5   : > { %v551_v57 = vpop.f32.mrf.mxu2 }
  0xcd   : > { %v553_v59 = vpop.f32.mrf.mxu2 }
 0x12e   : > { %v376_v24 = vpop.f32.mrf.mxu0  ;;  %v401_v25 = vpop.f32.mrf.mxu1 }
 0x12f   : > { %v402_v26 = vadd.f32 %v401_v25, %v376_v24 }
 0x131   : > { %v427_v28 = vadd.f32 %v423_v22, %v402_v26 }
 0x133   : > { %v434_v29 = vadd.f32 %v432_v27, %v427_v28 }
 0x135   : > { %v435_v30 = vmax.f32 %v434_v29, 0.0 }
 0x136   : > { %v378_v31 = vpop.f32.mrf.mxu0  ;;  %v403_v32 = vpop.f32.mrf.mxu1 }
 0x137   : > { %v438_v33 = vpack.c.bf16 %v435_v30, %v435_v30 }
 0x139   : > { %439 = vst [vmem:[#allocation3 + $0x4] sm:$0xf] %v438_v33 }
 0x140   : > { %v499_v34 = vld [vmem:[#allocation3 + $0x4] sm:$0xf] }
 0x141   : > { %v441_v35 = vld [vmem:[#allocation3] sm:$0xff]  ;;  %v504_v36 = vsel %vm363_vm1, %v499_v34, 0 }
 0x142   : > { %v446_v37 = vunpack.c.h.b16 %v441_v35  ;;  %528 = vst.msk [vmem:[#allocation3] sm:$0xf] %vm338_vm0, %v499_v34  ;;  %v445_v38 = vunpack.c.l.b16 %v441_v35  ;;  %513 = vmatpush.bf16.msrb.mxu1 %v504_v36 }
 0x144   : > { %v448_v39 = vpack.c.b16 %v446_v37, %v446_v37  ;;  %v447_v40 = vpack.c.b16 %v445_v38, %v445_v38 }
 0x145   : > { %684 = vmatmul.msk.bf16.vlgmr.msrb.gmra.mxu1 %vm359_vm2, %v498_v43 }
 0x146   : > { %451 = vrot.lane.b32.xlu0 %v448_v39, %s928_s22  ;;  %473 = vrot.lane.b32.xlu1 %v447_v40, %s927_s16 }
 0x147   : > { %449 = vrot.lane.b32.xlu2 %v447_v40, %s928_s22 }
 0x14e   : > { %523 = vperm.xlu0 %772, %v520_v44   ;;  %533 = vperm.xlu1 %773, %v530_v45  }
 0x14f   : > { %475 = vrot.lane.b32.xlu2 %v448_v39, %s927_s16 }
 0x1a1   : > { %v450_v46 = vpop.permute.xlu2 %449 }
 0x1a9   : > { %v476_v47 = vpop.permute.xlu2 %475 }
 0x1b8   : > { %v452_v48 = vpop.permute.xlu0 %451  ;;  %v474_v49 = vpop.permute.xlu1 %473 }
 0x1b9   : > { %v453_v50 = vsel %vm357_vm3, %v450_v46, %v452_v48  ;;  %v477_v51 = vsel %vm384_vm4, %v474_v49, %v476_v47 }
 0x1ba   : > { %v458_v52 = vsel %vm363_vm1, %v453_v50, 0  ;;  %v482_v53 = vsel %vm363_vm1, %v477_v51, 0 }
 0x1bb   : > { %467 = vmatpush.bf16.msra.mxu3 %v458_v52  ;;  %491 = vmatpush.bf16.msrb.mxu0 %v482_v53 }
 0x1be   : > { %682 = vmatmul.msk.bf16.vlgmr.msra.gmra.mxu3 %vm359_vm2, %v443_v54  ;;  %683 = vmatmul.msk.bf16.vlgmr.msrb.gmra.mxu0 %vm359_vm2, %v440_v55 }
 0x1c0   : > { %v524_v63 = vpop.permute.xlu0 %523  ;;  %v534_v1 = vpop.permute.xlu1 %533 }
 0x1c1   : > { %v552_v4 = vadd.f32 %v551_v57, %v534_v1 }
 0x1c2   : > { %v515_v56 = vpop.f32.mrf.mxu1 }
 0x1ca   : > { %v517_v58 = vpop.f32.mrf.mxu1 }
 0x23b   : > { %v493_v60 = vpop.f32.mrf.mxu0 }
 0x241   : > { %v469_v61 = vpop.f32.mrf.mxu3 }
 0x242   : > { %v494_v62 = vadd.f32 %v493_v60, %v469_v61 }
 0x243   : > { %v495_v0 = vpop.f32.mrf.mxu0 }
 0x244   : > { %v519_v2 = vadd.f32 %v515_v56, %v494_v62 }
 0x246   : > { %v526_v3 = vadd.f32 %v524_v63, %v519_v2 }
 0x248   : > { %v527_v5 = vmax.f32 %v526_v3, 0.0 }
 0x249   : > { %v471_v6 = vpop.f32.mrf.mxu3 }
 0x24a   : > { %v555_v7 = vadd.f32 %v552_v4, %v527_v5 }
 0x24c   : > { %v556_v8 = vmax.f32 %v555_v7, 0.0 }
 0x24e   : > { %557 = vst [vmem:[%s325_s30] sm:$0xff] %v556_v8 }
 0x24f   : > { %861 = shalt.err (!%p858_p9)
}
 0x250   : > { %698 = dma.vmem_to_hbm [thread:$0]  (%p1009_p4), %s573_s8, 128, %s575_s10, %s559_s12  }
 0x251 PF: > { %p715_p10 = scmp.ge.s32.totalorder %s920_s29, 2  ;;  %s586_s19 = sand.u32 1, %s900_s24  }
 0x252   : > { %s587_s22 = scalar_lea.sflag [#allocation6], %s586_s19 }
 0x253   : > { %p708_p11 = pnand %p715_p10, %p1016_p8 }
 0x255   : > { %p709_p12 = pneg %p708_p11 }
 0x257   : > { %895 = dma.done.wait (%p709_p12), %s587_s22, 128  }
 0x258   : > { %897 = vsyncadd (%p709_p12), %s587_s22, 4294967168  ;;  %s22_s29 = sadd.s32 1, %s920_s29   ;;  %s1152_s24 = smov %s904_s25 }
 0x259   : > { %p19_p13 = scmp.ge.s32.totalorder %s22_s29, 4   ;;  %s1153_s25 = smov %s908_s26 }
 0x25a   : > { %s1154_s26 = smov %s1022_s14  ;;  %s1155_s27 = smov %s916_s28 }
 0x25b   : > { %s1156_s28 = smov %s1158_s9  ;;  %21 = sbr.rel (!%p19_p13) target bundleno = 6 (0x6), region = 100 }
 0x260   :  { %593 = vsyncpa [#allocation5], 1 }
 0x261   :  { %595 = vsyncpa [#allocation5 + $0x1], 1 }
 0x262   :  { %596 = vsyncpa [#allocation8], 1 }
 0x263   :  { %597 = vsyncpa [#allocation6], 1 }
 0x264   :  { %599 = vsyncpa [#allocation6 + $0x1], 1 }

</bundles_post_ra>
